<compile_context>
chip_gen: v6e
topology: v6e:2x2x1
jax: 0.10.0
libtpu: 0.0.40
codegen_flags: <defaults>
</compile_context>

<pallas_src>
import functools

import jax
import jax.numpy as jnp
from jax.experimental import pallas as pl
from jax.experimental.pallas import tpu as pltpu


def _round_up(x, m):
    return ((x + m - 1) // m) * m


def _leaky_relu(x, slope=0.2):
    # Valid for slope in (0, 1): max(x, slope*x) == LeakyReLU(x).
    return jnp.maximum(x, slope * x)


def _pick_compute_dtype():
    """bf16 elementwise on chips with a bf16 VPU (v6e / v7x), else f32."""
    kind = jax.devices()[0].device_kind.lower()
    if any(tag in kind for tag in ("v6", "v7", "7x")):
        return jnp.bfloat16
    return jnp.float32


def mlp_kernel(x_ref, w1_ref, b1_ref, w2_ref, b2_ref, w3_ref, b3_ref, o_ref,
               *, compute_dtype):
    # Layer 1: cast the f32 x tile to bf16 at the MXU input; accumulate in f32.
    x = x_ref[...].astype(jnp.bfloat16)
    h = jnp.dot(x, w1_ref[...], preferred_element_type=jnp.float32)
    h = _leaky_relu(h.astype(compute_dtype) + b1_ref[...])

    # Layer 2.
    h = jnp.dot(h.astype(jnp.bfloat16), w2_ref[...],
                preferred_element_type=jnp.float32)
    h = _leaky_relu(h.astype(compute_dtype) + b2_ref[...])

    # Layer 3: w3 zero-padded to (H, 128); only column 0 carries the output.
    logits = jnp.dot(h.astype(jnp.bfloat16), w3_ref[...],
                     preferred_element_type=jnp.float32)

    # b3 comes from SMEM as a true scalar.
    o_ref[...] = logits[:, 0:1] + b3_ref[0, 0]


def prepare_params(params, compute_dtype):
    """One-time layout/cast prep of the linear-layer parameters (not per call)."""
    H = params["w1"].shape[1]
    w3 = params["w3"].reshape(H, 1).astype(jnp.bfloat16)
    w3_pad = jnp.pad(w3, ((0, 0), (0, 127)))  # (H, 128), column 0 = w3
    return {
        "w1": params["w1"].astype(jnp.bfloat16),
        "b1": params["b1"].reshape(1, H).astype(compute_dtype),
        "w2": params["w2"].astype(jnp.bfloat16),
        "b2": params["b2"].reshape(1, H).astype(compute_dtype),
        "w3": w3_pad,
        "b3": params["b3"].reshape(1, 1).astype(jnp.float32),
    }


@functools.partial(jax.jit, static_argnames=("tile_b", "compute_dtype"))
def binary_clf_forward(x, prepped, tile_b=4096, compute_dtype=jnp.bfloat16):
    """Fused 3-layer MLP forward (eval mode) as a single Pallas kernel.

    x:       (B, in_features) float32
    prepped: output of prepare_params()
    returns  (B, 1) float32 logits
    """
    B, F = x.shape
    H = prepped["w1"].shape[1]

    # Batch tile: >=16 sublanes (bf16 intermediates), at most the default tile.
    # Ragged last block is handled by Pallas boundary-block clipping.
    tile_b = min(tile_b, max(16, _round_up(B, 16)))
    grid = (pl.cdiv(B, tile_b),)

    kernel = functools.partial(mlp_kernel, compute_dtype=compute_dtype)

    out = pl.pallas_call(
        kernel,
        out_shape=jax.ShapeDtypeStruct((B, 1), jnp.float32),
        grid=grid,
        in_specs=[
            pl.BlockSpec((tile_b, F), lambda i: (i, 0)),        # x tile (f32, unpadded)
            pl.BlockSpec((F, H), lambda i: (0, 0)),             # w1 (VMEM-resident)
            pl.BlockSpec((1, H), lambda i: (0, 0)),             # b1
            pl.BlockSpec((H, H), lambda i: (0, 0)),             # w2
            pl.BlockSpec((1, H), lambda i: (0, 0)),             # b2
            pl.BlockSpec((H, 128), lambda i: (0, 0)),           # w3 (lane-padded)
            pl.BlockSpec(memory_space=pltpu.MemorySpace.SMEM),  # b3 scalar
        ],
        out_specs=pl.BlockSpec((tile_b, 1), lambda i: (i, 0)),
        compiler_params=pltpu.CompilerParams(
            dimension_semantics=("parallel",),
            vmem_limit_bytes=48 * 1024 * 1024,
        ),
    )(x, prepped["w1"], prepped["b1"], prepped["w2"], prepped["b2"],
      prepped["w3"], prepped["b3"])

    return out


def init_params(key, in_features, hidden_size=256):
    """Deterministic init mimicking nn.Linear's uniform(-1/sqrt(fan_in), ...)."""
    ks = jax.random.split(key, 6)

    def linear(kw, kb, fan_in, fan_out):
        bound = 1.0 / jnp.sqrt(fan_in)
        w = jax.random.uniform(kw, (fan_in, fan_out), jnp.float32, -bound, bound)
        b = jax.random.uniform(kb, (1, fan_out), jnp.float32, -bound, bound)
        return w, b

    w1, b1 = linear(ks[0], ks[1], in_features, hidden_size)
    w2, b2 = linear(ks[2], ks[3], hidden_size, hidden_size)
    w3, b3 = linear(ks[4], ks[5], hidden_size, 1)
    return {"w1": w1, "b1": b1, "w2": w2, "b2": b2, "w3": w3, "b3": b3}


def reference_forward(x, p):
    """Plain-JAX f32 reference for correctness check."""
    h = _leaky_relu(x @ p["w1"] + p["b1"])
    h = _leaky_relu(h @ p["w2"] + p["b2"])
    return h @ p["w3"] + p["b3"]


if __name__ == "__main__":
    key = jax.random.PRNGKey(0)
    k_x1, k_x2, k_p = jax.random.split(key, 3)

    in_features, hidden = 32, 256
    params = init_params(k_p, in_features, hidden)
    compute_dtype = _pick_compute_dtype()
    prepped = prepare_params(params, compute_dtype)

    # Test 1: tiny batch -> single (ragged) grid step.
    x1 = jax.random.normal(k_x1, (8, in_features), jnp.float32)
    out1 = binary_clf_forward(x1, prepped, compute_dtype=compute_dtype)
    jax.block_until_ready(out1)
    ref1 = reference_forward(x1, params)
    assert out1.shape == (8, 1)
    assert jnp.allclose(out1, ref1, atol=5e-2, rtol=5e-2), "mismatch (test 1)"

    # Test 2: multi-step grid with a ragged last block (300 = 2*128 + 44).
    x2 = jax.random.normal(k_x2, (300, in_features), jnp.float32)
    out2 = binary_clf_forward(x2, prepped, tile_b=128, compute_dtype=compute_dtype)
    jax.block_until_ready(out2)
    ref2 = reference_forward(x2, params)
    assert out2.shape == (300, 1)
    assert jnp.allclose(out2, ref2, atol=5e-2, rtol=5e-2), "mismatch (test 2)"

    print("KERNEL_OK")
</pallas_src>

<mosaic_0001>
module attributes {stable_mosaic.version = 11 : i64} {
  func.func @mlp_kernel(%arg0: i32, %arg1: memref<16x32xf32, #tpu.memory_space<vmem>>, %arg2: memref<32x256xbf16, #tpu.memory_space<vmem>>, %arg3: memref<1x256xf32, #tpu.memory_space<vmem>>, %arg4: memref<256x256xbf16, #tpu.memory_space<vmem>>, %arg5: memref<1x256xf32, #tpu.memory_space<vmem>>, %arg6: memref<256x128xbf16, #tpu.memory_space<vmem>>, %arg7: memref<1x1xf32, #tpu.memory_space<smem>>, %arg8: memref<16x1xf32, #tpu.memory_space<vmem>>) attributes {dimension_semantics = [#tpu.dimension_semantics<parallel>], iteration_bounds = array<i64: 1>, scalar_prefetch = 0 : i64, scratch_operands = 0 : i64, tpu.core_type = #tpu.core_type<tc>, window_params = [{transform_indices = @transform_0, window_bounds = array<i64: 16, 32>}, {pipeline_mode = #tpu.pipeline_mode<synchronous>, transform_indices = @transform_1, window_bounds = array<i64: 32, 256>}, {pipeline_mode = #tpu.pipeline_mode<synchronous>, transform_indices = @transform_2, window_bounds = array<i64: 1, 256>}, {pipeline_mode = #tpu.pipeline_mode<synchronous>, transform_indices = @transform_3, window_bounds = array<i64: 256, 256>}, {pipeline_mode = #tpu.pipeline_mode<synchronous>, transform_indices = @transform_4, window_bounds = array<i64: 1, 256>}, {pipeline_mode = #tpu.pipeline_mode<synchronous>, transform_indices = @transform_5, window_bounds = array<i64: 256, 128>}, {transform_indices = @transform_6, window_bounds = array<i64: 1, 1>}, {transform_indices = @transform_7, window_bounds = array<i64: 16, 1>}]} {
    %c0 = arith.constant 0 : index
    %c0_0 = arith.constant 0 : index
    %0 = vector.load %arg1[%c0, %c0_0] : memref<16x32xf32, #tpu.memory_space<vmem>>, vector<16x32xf32>
    %1 = arith.truncf %0 : vector<16x32xf32> to vector<16x32xbf16>
    %c0_1 = arith.constant 0 : index
    %c0_2 = arith.constant 0 : index
    %2 = vector.load %arg2[%c0_1, %c0_2] : memref<32x256xbf16, #tpu.memory_space<vmem>>, vector<32x256xbf16>
    %cst = arith.constant dense<0.000000e+00> : vector<16x256xf32>
    %3 = tpu.matmul %1, %2, %cst {dimension_numbers = #tpu.dot_dimension_numbers<[1], [0], [0], [1], [0, 0, 1, 1], [], []>} : vector<16x32xbf16>, vector<32x256xbf16>, vector<16x256xf32> -> vector<16x256xf32>
    %c0_3 = arith.constant 0 : index
    %c0_4 = arith.constant 0 : index
    %4 = vector.load %arg3[%c0_3, %c0_4] : memref<1x256xf32, #tpu.memory_space<vmem>>, vector<1x256xf32>
    %5 = vector.broadcast %4 : vector<1x256xf32> to vector<16x256xf32>
    %6 = arith.addf %3, %5 : vector<16x256xf32>
    %cst_5 = arith.constant 2.000000e-01 : f32
    %7 = vector.broadcast %cst_5 : f32 to vector<16x256xf32>
    %8 = arith.mulf %7, %6 : vector<16x256xf32>
    %9 = arith.maximumf %6, %8 : vector<16x256xf32>
    %10 = arith.truncf %9 : vector<16x256xf32> to vector<16x256xbf16>
    %c0_6 = arith.constant 0 : index
    %c0_7 = arith.constant 0 : index
    %11 = vector.load %arg4[%c0_6, %c0_7] : memref<256x256xbf16, #tpu.memory_space<vmem>>, vector<256x256xbf16>
    %cst_8 = arith.constant dense<0.000000e+00> : vector<16x256xf32>
    %12 = tpu.matmul %10, %11, %cst_8 {dimension_numbers = #tpu.dot_dimension_numbers<[1], [0], [0], [1], [0, 0, 1, 1], [], []>} : vector<16x256xbf16>, vector<256x256xbf16>, vector<16x256xf32> -> vector<16x256xf32>
    %c0_9 = arith.constant 0 : index
    %c0_10 = arith.constant 0 : index
    %13 = vector.load %arg5[%c0_9, %c0_10] : memref<1x256xf32, #tpu.memory_space<vmem>>, vector<1x256xf32>
    %14 = vector.broadcast %13 : vector<1x256xf32> to vector<16x256xf32>
    %15 = arith.addf %12, %14 : vector<16x256xf32>
    %cst_11 = arith.constant 2.000000e-01 : f32
    %16 = vector.broadcast %cst_11 : f32 to vector<16x256xf32>
    %17 = arith.mulf %16, %15 : vector<16x256xf32>
    %18 = arith.maximumf %15, %17 : vector<16x256xf32>
    %19 = arith.truncf %18 : vector<16x256xf32> to vector<16x256xbf16>
    %c0_12 = arith.constant 0 : index
    %c0_13 = arith.constant 0 : index
    %20 = vector.load %arg6[%c0_12, %c0_13] : memref<256x128xbf16, #tpu.memory_space<vmem>>, vector<256x128xbf16>
    %cst_14 = arith.constant dense<0.000000e+00> : vector<16x128xf32>
    %21 = tpu.matmul %19, %20, %cst_14 {dimension_numbers = #tpu.dot_dimension_numbers<[1], [0], [0], [1], [0, 0, 1, 1], [], []>} : vector<16x256xbf16>, vector<256x128xbf16>, vector<16x128xf32> -> vector<16x128xf32>
    %22 = vector.extract_strided_slice %21 {offsets = [0, 0], sizes = [16, 1], strides = [1, 1]} : vector<16x128xf32> to vector<16x1xf32>
    %c0_15 = arith.constant 0 : index
    %c0_16 = arith.constant 0 : index
    %23 = memref.load %arg7[%c0_15, %c0_16] : memref<1x1xf32, #tpu.memory_space<smem>>
    %24 = vector.broadcast %23 : f32 to vector<16x1xf32>
    %25 = arith.addf %22, %24 : vector<16x1xf32>
    %c0_17 = arith.constant 0 : index
    %c0_18 = arith.constant 0 : index
    %26 = vector.load %arg8[%c0_17, %c0_18] : memref<16x1xf32, #tpu.memory_space<vmem>>, vector<16x1xf32>
    tpu.vector_store %arg8[%c0_17, %c0_18], %25 {strides = array<i32>} : memref<16x1xf32, #tpu.memory_space<vmem>>, vector<16x1xf32>,
    return
  }
  func.func @transform_0(%arg0: i32) -> (i32, i32) {
    %c0_i32 = arith.constant 0 : i32
    %c0_i32_0 = arith.constant 0 : i32
    return %arg0, %c0_i32 : i32, i32
  }
  func.func @transform_1(%arg0: i32) -> (i32, i32) {
    %c0_i32 = arith.constant 0 : i32
    %c0_i32_0 = arith.constant 0 : i32
    %c0_i32_1 = arith.constant 0 : i32
    return %c0_i32, %c0_i32_0 : i32, i32
  }
  func.func @transform_2(%arg0: i32) -> (i32, i32) {
    %c0_i32 = arith.constant 0 : i32
    %c0_i32_0 = arith.constant 0 : i32
    %c0_i32_1 = arith.constant 0 : i32
    return %c0_i32, %c0_i32_0 : i32, i32
  }
  func.func @transform_3(%arg0: i32) -> (i32, i32) {
    %c0_i32 = arith.constant 0 : i32
    %c0_i32_0 = arith.constant 0 : i32
    %c0_i32_1 = arith.constant 0 : i32
    return %c0_i32, %c0_i32_0 : i32, i32
  }
  func.func @transform_4(%arg0: i32) -> (i32, i32) {
    %c0_i32 = arith.constant 0 : i32
    %c0_i32_0 = arith.constant 0 : i32
    %c0_i32_1 = arith.constant 0 : i32
    return %c0_i32, %c0_i32_0 : i32, i32
  }
  func.func @transform_5(%arg0: i32) -> (i32, i32) {
    %c0_i32 = arith.constant 0 : i32
    %c0_i32_0 = arith.constant 0 : i32
    %c0_i32_1 = arith.constant 0 : i32
    return %c0_i32, %c0_i32_0 : i32, i32
  }
  func.func @transform_6(%arg0: i32) -> (i32, i32) {
    %c0_i32 = arith.constant 0 : i32
    %c0_i32_0 = arith.constant 0 : i32
    %c0_i32_1 = arith.constant 0 : i32
    return %c0_i32, %c0_i32_0 : i32, i32
  }
  func.func @transform_7(%arg0: i32) -> (i32, i32) {
    %c0_i32 = arith.constant 0 : i32
    %c0_i32_0 = arith.constant 0 : i32
    return %arg0, %c0_i32 : i32, i32
  }
}

</mosaic_0001>

<bundles_post_ra>
// kernel: binary_clf_forward.1
= control target key start
LH: loop header
LB: loop body
LE: loop exit
PB: predicated region body
PF: predicated region fallthrough
CT: control target
= control target key end

     0   :  { %13 = vsyncpa [#allocation4], 0  ;;  %s969_s0 = inlined_call_operand.hbm [shape: f32[8,32], index: 0, kind: input, shape index: {}]   ;;  %s970_s1 = inlined_call_operand.hbm [shape: bf16[32,256], index: 1, kind: input, shape index: {}]   ;;  %s971_s2 = inlined_call_operand.vmem [shape: f32[1,256], index: 2, kind: input, shape index: {}]   ;;  %s972_s3 = inlined_call_operand.hbm [shape: bf16[256,256], index: 3, kind: input, shape index: {}]   ;;  %s973_s4 = inlined_call_operand.vmem [shape: f32[1,256], index: 4, kind: input, shape index: {}]   ;;  %s974_s5 = inlined_call_operand.hbm [shape: bf16[256,128], index: 5, kind: input, shape index: {}]   ;;  %s975_s6 = inlined_call_operand.<no memory space> [shape: f32[1,1], index: 6, kind: input, shape index: {}]   ;;  %s976_s7 = inlined_call_operand.vmem [shape: f32[8,1], index: 7, kind: output, shape index: {}]  }
   0x1   :  { %14 = vsyncpa [#allocation6], 0 }
   0x2   :  { %15 = vsyncpa [#allocation9], 0 }
   0x3   :  { %20 = vsyncadd [#allocation4], 128  ;;  %s896_s24 = smov [#allocation5]   ;;  %s897_s26 = smov [#allocation3]  }
   0x4   :  { %s33_s25 = sshll.u32 %s896_s24, 4  ;;  %s21_s27 = sshll.u32 %s897_s26, 4  ;;  %s34_s25 = int_to_ptr.vmem [resolvable:$true] %s33_s25  ;;  %s22_s27 = int_to_ptr.vmem [resolvable:$true] %s21_s27 }
   0x5   :  { %s818_s28 = scalar_lea.vmem %s34_s25, 512  ;;  %p823_p1 = scmp.lt.s32.totalorder %s34_s25, %s34_s25 }
   0x6   :  { %p819_p0 = scmp.ne.s32.totalorder %s34_s25, %s818_s28  ;;  %p824_p2 = scmp.lt.s32.totalorder %s818_s28, %s818_s28 }
   0x8   :  { %p825_p3 = por %p824_p2, %p823_p1 }
   0xa   :  { %p826_p4 = pnand %p825_p3, %p819_p0 }
   0xc   :  { %829 = shalt.err (!%p826_p4)
}
   0xd   :  { %s898_s29 = smov 128   ;;  %s899_s30 = smov 8  }
   0xe   :  { %39 = dma.hbm_to_vmem [thread:$0]  %s970_s1, 512, %s34_s25, [#allocation6], %s898_s29, %s898_s29, %s899_s30  }
   0xf   :  { %s838_s10 = scalar_lea.vmem %s22_s27, 128  ;;  %s842_s11 = scalar_lea.vmem %s22_s27, 256 }
  0x10   :  { %p839_p5 = scmp.ne.s32.totalorder %s22_s27, %s838_s10  ;;  %p843_p6 = scmp.lt.s32.totalorder %s22_s27, %s22_s27 }
  0x11   :  { %p844_p7 = scmp.lt.s32.totalorder %s842_s11, %s838_s10 }
  0x13   :  { %p845_p8 = por %p844_p7, %p843_p6 }
  0x15   :  { %p846_p9 = pnand %p845_p8, %p839_p5 }
  0x17   :  { %849 = shalt.err (!%p846_p9)
}
  0x18   :  { %27 = dma.hbm_to_vmem [thread:$0]  %s969_s0, 128, %s22_s27, [#allocation4], %s898_s29, %s898_s29, %s899_s30  }
  0x19   :  { %s900_s14 = smov [#allocation7]   ;;  %s901_s16 = smov [#allocation8]  }
  0x1a   :  { %s47_s15 = sshll.u32 %s900_s14, 4  ;;  %s61_s17 = sshll.u32 %s901_s16, 4  ;;  %s48_s15 = int_to_ptr.vmem [resolvable:$true] %s47_s15  ;;  %s62_s17 = int_to_ptr.vmem [resolvable:$true] %s61_s17 }
  0x1b   :  { %s858_s18 = scalar_lea.vmem %s48_s15, 4096  ;;  %p863_p11 = scmp.lt.s32.totalorder %s48_s15, %s48_s15 }
  0x1c   :  { %p859_p10 = scmp.ne.s32.totalorder %s48_s15, %s858_s18  ;;  %p864_p12 = scmp.lt.s32.totalorder %s858_s18, %s858_s18 }
  0x1e   :  { %p865_p13 = por %p864_p12, %p863_p11 }
  0x20   :  { %p866_p0 = pnand %p865_p13, %p859_p10 }
  0x22   :  { %869 = shalt.err (!%p866_p0)
}
  0x23   :  { %53 = dma.hbm_to_vmem [thread:$0]  %s972_s3, 4096, %s48_s15, [#allocation6], %s898_s29, %s898_s29, %s899_s30  }
  0x24   :  { %s878_s20 = scalar_lea.vmem %s62_s17, 2048  ;;  %p883_p2 = scmp.lt.s32.totalorder %s62_s17, %s62_s17 }
  0x25   :  { %p879_p1 = scmp.ne.s32.totalorder %s62_s17, %s878_s20  ;;  %p884_p3 = scmp.lt.s32.totalorder %s878_s20, %s878_s20 }
  0x27   :  { %p885_p4 = por %p884_p3, %p883_p2 }
  0x29   :  { %p886_p5 = pnand %p885_p4, %p879_p1 }
  0x2b   :  { %889 = shalt.err (!%p886_p5)
}
  0x2c   :  { %s902_s0 = smov 64   ;;  %s903_s21 = smov 4  }
  0x2d   :  { %67 = dma.hbm_to_vmem [thread:$0]  %s974_s5, 2048, %s62_s17, [#allocation9], %s902_s0, %s902_s0, %s903_s21  }
  0x2e   :  { %890 = dma.done.wait [#allocation4], 256  }
  0x2f   :  { %891 = vsyncadd [#allocation4], 4294967040 }
  0x30   :  { %892 = dma.done.wait [#allocation6], 4608  }
  0x31   :  { %893 = vsyncadd [#allocation6], 4294962688 }
  0x32   :  { %894 = dma.done.wait [#allocation9], 2048  }
  0x33   :  { %895 = vsyncadd [#allocation9], 4294965248  ;;  %v904_v0 = vmov 0   ;;  %v740_v1 = vld [vmem:[#allocation5 + $0x14] ss:$8 sps:$4 sm:$0xff]   ;;  %vm122_vm0 = vcmask 261120   ;;  %v92_v48 = vlaneseq }
  0x34   :  { %158 = vmatprep.mubr.bf16.mxu0 %v904_v0  ;;  %v742_v2 = vld [vmem:[#allocation5 + $0x10] ss:$8 sps:$4 sm:$0xff]   ;;  %138 = vmatprep.subr.bf16.mxu0 %v740_v1  ;;  %v743_v3 = vld [vmem:[#allocation5 + $0x4] ss:$8 sps:$4 sm:$0xff]   ;;  %v745_v4 = vld [vmem:[#allocation5] ss:$8 sps:$4 sm:$0xff]  }
  0x35   :  { %v83_v5 = vld [vmem:[#allocation3] sm:$0xff]  ;;  %139 = vmatpush1.bf16.msra.mxu0 %v742_v2  ;;  %v84_v6 = vld [vmem:[#allocation3 + $0x8] sm:$0xff]  ;;  %v749_v9 = vld [vmem:[#allocation7 + $0x64] ss:$8 sps:$4 sm:$0xff]   ;;  %v93_v49 = vshrl.u32 %v92_v48, 7  ;;  %vm609_vm1 = vcmask 7168  }
  0x36   :  { %140 = vmatprep.subr.bf16.mxu0 %v743_v3  ;;  %v746_v7 = vld [vmem:[#allocation7 + $0x74] ss:$8 sps:$4 sm:$0xff]   ;;  %v748_v8 = vld [vmem:[#allocation7 + $0x70] ss:$8 sps:$4 sm:$0xff]   ;;  %v85_v10 = vpack.c.bf16 %v84_v6, %v83_v5  ;;  %v751_v11 = vld [vmem:[#allocation7 + $0x60] ss:$8 sps:$4 sm:$0xff]  }
  0x37   :  { %383 = vmatprep.subr.bf16.mxu1 %v746_v7  ;;  %v752_v12 = vld [vmem:[#allocation7 + $0x54] ss:$8 sps:$4 sm:$0xff]   ;;  %v754_v13 = vld [vmem:[#allocation7 + $0x50] ss:$8 sps:$4 sm:$0xff]   ;;  %v755_v14 = vld [vmem:[#allocation7 + $0x44] ss:$8 sps:$4 sm:$0xff]  }
  0x38   :  { %384 = vmatpush1.bf16.msra.mxu1 %v748_v8  ;;  %v757_v15 = vld [vmem:[#allocation7 + $0x40] ss:$8 sps:$4 sm:$0xff]   ;;  %v758_v16 = vld [vmem:[#allocation7 + $0x34] ss:$8 sps:$4 sm:$0xff]   ;;  %v760_v17 = vld [vmem:[#allocation7 + $0x30] ss:$8 sps:$4 sm:$0xff]  }
  0x39   :  { %141 = vmatpush1.bf16.msra.mxu0 %v745_v4  ;;  %385 = vmatprep.subr.bf16.mxu1 %v749_v9  ;;  %v761_v18 = vld [vmem:[#allocation7 + $0x24] ss:$8 sps:$4 sm:$0xff]   ;;  %v763_v19 = vld [vmem:[#allocation7 + $0x20] ss:$8 sps:$4 sm:$0xff]   ;;  %v764_v20 = vld [vmem:[#allocation7 + $0x14] ss:$8 sps:$4 sm:$0xff]  }
  0x3a   :  { %v766_v21 = vld [vmem:[#allocation7 + $0x10] ss:$8 sps:$4 sm:$0xff]   ;;  %v767_v22 = vld [vmem:[#allocation7 + $0x4] ss:$8 sps:$4 sm:$0xff]   ;;  %v769_v23 = vld [vmem:[#allocation7] ss:$8 sps:$4 sm:$0xff]  }
  0x3b   :  { %v770_v24 = vld [vmem:[#allocation7 + $0xf4] ss:$8 sps:$4 sm:$0xff]   ;;  %v772_v25 = vld [vmem:[#allocation7 + $0xf0] ss:$8 sps:$4 sm:$0xff]   ;;  %v773_v26 = vld [vmem:[#allocation7 + $0xe4] ss:$8 sps:$4 sm:$0xff]  }
  0x3c   :  { %660 = vmatmul.mubr.msk.bf16.vlgmr.msra.gmra.mxu0 %vm122_vm0, %v85_v10  ;;  %386 = vmatpush1.bf16.msra.mxu1 %v751_v11  ;;  %v775_v27 = vld [vmem:[#allocation7 + $0xe0] ss:$8 sps:$4 sm:$0xff]   ;;  %v776_v28 = vld [vmem:[#allocation7 + $0xd4] ss:$8 sps:$4 sm:$0xff]   ;;  %v778_v29 = vld [vmem:[#allocation7 + $0xd0] ss:$8 sps:$4 sm:$0xff]  }
  0x3d   :  { %387 = vmatprep.subr.bf16.mxu1 %v752_v12  ;;  %v779_v30 = vld [vmem:[#allocation7 + $0xc4] ss:$8 sps:$4 sm:$0xff]   ;;  %v781_v31 = vld [vmem:[#allocation7 + $0xc0] ss:$8 sps:$4 sm:$0xff]   ;;  %v782_v32 = vld [vmem:[#allocation7 + $0xb4] ss:$8 sps:$4 sm:$0xff]  }
  0x3e   :  { %v784_v33 = vld [vmem:[#allocation7 + $0xb0] ss:$8 sps:$4 sm:$0xff]   ;;  %v785_v34 = vld [vmem:[#allocation7 + $0xa4] ss:$8 sps:$4 sm:$0xff]   ;;  %v787_v35 = vld [vmem:[#allocation7 + $0xa0] ss:$8 sps:$4 sm:$0xff]  }
  0x3f   :  { %v788_v36 = vld [vmem:[#allocation7 + $0x94] ss:$8 sps:$4 sm:$0xff]   ;;  %v790_v37 = vld [vmem:[#allocation7 + $0x90] ss:$8 sps:$4 sm:$0xff]   ;;  %v791_v38 = vld [vmem:[#allocation7 + $0x84] ss:$8 sps:$4 sm:$0xff]  }
  0x40   :  { %388 = vmatpush1.bf16.msra.mxu1 %v754_v13  ;;  %v793_v39 = vld [vmem:[#allocation7 + $0x80] ss:$8 sps:$4 sm:$0xff]   ;;  %v794_v40 = vld [vmem:[#allocation8 + $0x78] sm:$0xff]   ;;  %v796_v42 = vld [vmem:[#allocation8 + $0x70] sm:$0xff]   ;;  %v98_v50 = vsub.s32 1, %v93_v49  ;;  %v94_v51 = vsub.s32 0, %v93_v49 }
  0x41   :  { %389 = vmatprep.subr.bf16.mxu1 %v755_v14  ;;  %v795_v41 = vld [vmem:[#allocation8 + $0x38] sm:$0xff]   ;;  %709 = vmatprep.subr.bf16.mxu0 %v794_v40  ;;  %v797_v43 = vld [vmem:[#allocation8 + $0x30] sm:$0xff]   ;;  %v798_v44 = vld [vmem:[#allocation8 + $0x68] sm:$0xff]   ;;  %v606_v40 = vstv %s975_s6 }
  0x42   :  { %710 = vmatpush3.bf16.msra.mxu0 %v795_v41  ;;  %v799_v45 = vld [vmem:[#allocation8 + $0x28] sm:$0xff]   ;;  %v800_v46 = vld [vmem:[#allocation8 + $0x60] sm:$0xff]   ;;  %v90_v52 = vld [vmem:[%s971_s2] sm:$0x3] }
  0x43   :  { %711 = vmatprep.subr.bf16.mxu0 %v796_v42  ;;  %v801_v47 = vld [vmem:[#allocation8 + $0x20] sm:$0xff]   ;;  %v99_v53 = vrot.slane %v90_v52, %v98_v50  ;;  %v95_v54 = vrot.slane %v90_v52, %v94_v51  ;;  %v802_v9 = vld [vmem:[#allocation8 + $0x58] sm:$0xff]   ;;  %v804_v11 = vld [vmem:[#allocation8 + $0x50] sm:$0xff]  }
  0x44   :  { %390 = vmatpush1.bf16.msra.mxu1 %v757_v15  ;;  %v803_v10 = vld [vmem:[#allocation8 + $0x18] sm:$0xff]   ;;  %v805_v12 = vld [vmem:[#allocation8 + $0x10] sm:$0xff]   ;;  %v806_v13 = vld [vmem:[#allocation8 + $0x48] sm:$0xff]  }
  0x45   :  { %391 = vmatprep.subr.bf16.mxu1 %v758_v16  ;;  %v807_v14 = vld [vmem:[#allocation8 + $0x8] sm:$0xff]   ;;  %v808_v15 = vld [vmem:[#allocation8 + $0x40] sm:$0xff]  }
  0x46   :  { %712 = vmatpush3.bf16.msra.mxu0 %v797_v43  ;;  %v809_v16 = vld [vmem:[#allocation8] sm:$0xff]  }
  0x47   :  { %713 = vmatprep.subr.bf16.mxu0 %v798_v44 }
  0x48   :  { %392 = vmatpush1.bf16.msra.mxu1 %v760_v17  ;;  %v211_v17 = vld [vmem:[%s973_s4] sm:$0x3] }
  0x49   :  { %393 = vmatprep.subr.bf16.mxu1 %v761_v18  ;;  %v220_v18 = vrot.slane %v211_v17, %v98_v50 }
  0x4a   :  { %714 = vmatpush3.bf16.msra.mxu0 %v799_v45 }
  0x4b   :  { %715 = vmatprep.subr.bf16.mxu0 %v800_v46 }
  0x4c   :  { %394 = vmatpush1.bf16.msra.mxu1 %v763_v19  ;;  %v216_v19 = vrot.slane %v211_v17, %v94_v51 }
  0x4d   :  { %395 = vmatprep.subr.bf16.mxu1 %v764_v20 }
  0x4e   :  { %716 = vmatpush3.bf16.msra.mxu0 %v801_v47 }
  0x4f   :  { %717 = vmatprep.subr.bf16.mxu0 %v802_v9 }
  0x50   :  { %396 = vmatpush1.bf16.msra.mxu1 %v766_v21 }
  0x51   :  { %397 = vmatprep.subr.bf16.mxu1 %v767_v22 }
  0x52   :  { %718 = vmatpush3.bf16.msra.mxu0 %v803_v10 }
  0x53   :  { %719 = vmatprep.subr.bf16.mxu0 %v804_v11 }
  0x54   :  { %398 = vmatpush1.bf16.msra.mxu1 %v769_v23 }
  0x55   :  { %399 = vmatprep.subr.bf16.mxu1 %v770_v24 }
  0x56   :  { %720 = vmatpush3.bf16.msra.mxu0 %v805_v12 }
  0x57   :  { %721 = vmatprep.subr.bf16.mxu0 %v806_v13 }
  0x58   :  { %400 = vmatpush2.bf16.msra.mxu1 %v772_v25 }
  0x59   :  { %401 = vmatprep.subr.bf16.mxu1 %v773_v26 }
  0x5a   :  { %722 = vmatpush3.bf16.msra.mxu0 %v807_v14 }
  0x5b   :  { %723 = vmatprep.subr.bf16.mxu0 %v808_v15 }
  0x5c   :  { %402 = vmatpush2.bf16.msra.mxu1 %v775_v27 }
  0x5d   :  { %403 = vmatprep.subr.bf16.mxu1 %v776_v28 }
  0x5e   :  { %724 = vmatpush3.bf16.msra.mxu0 %v809_v16 }
  0x60   :  { %404 = vmatpush2.bf16.msra.mxu1 %v778_v29 }
  0x61   :  { %405 = vmatprep.subr.bf16.mxu1 %v779_v30 }
  0x64   :  { %406 = vmatpush2.bf16.msra.mxu1 %v781_v31 }
  0x65   :  { %407 = vmatprep.subr.bf16.mxu1 %v782_v32 }
  0x68   :  { %408 = vmatpush2.bf16.msra.mxu1 %v784_v33 }
  0x69   :  { %409 = vmatprep.subr.bf16.mxu1 %v785_v34 }
  0x6c   :  { %410 = vmatpush2.bf16.msra.mxu1 %v787_v35 }
  0x6d   :  { %411 = vmatprep.subr.bf16.mxu1 %v788_v36 }
  0x70   :  { %412 = vmatpush2.bf16.msra.mxu1 %v790_v37 }
  0x71   :  { %413 = vmatprep.subr.bf16.mxu1 %v791_v38 }
  0x74   :  { %414 = vmatpush2.bf16.msra.mxu1 %v793_v39 }
  0xfc   :  { %v160_v55 = vpop.f32.mrf.mxu0 }
  0xfd   :  { %v161_v58 = vadd.f32 %v160_v55, %v95_v54 }
  0xfe   :  { %v162_v56 = vpop.f32.mrf.mxu0 }
  0xff   :  { %v163_v57 = vadd.f32 %v162_v56, %v99_v53  ;;  %v169_v1 = vmul.f32 0.2, %v161_v58 }
 0x100   :  { %v164_v59 = vpop.f32.mrf.mxu0 }
 0x101   :  { %v165_v60 = vadd.f32 %v164_v59, %v95_v54  ;;  %v170_v62 = vmul.f32 0.2, %v163_v57  ;;  %v173_v6 = vmax.f32 %v161_v58, %v169_v1 }
 0x102   :  { %v166_v61 = vpop.f32.mrf.mxu0 }
 0x103   :  { %v171_v63 = vmul.f32 0.2, %v165_v60  ;;  %v167_v0 = vadd.f32 %v166_v61, %v99_v53  ;;  %v174_v4 = vmax.f32 %v163_v57, %v170_v62 }
 0x105   :  { %v172_v2 = vmul.f32 0.2, %v167_v0  ;;  %v175_v3 = vmax.f32 %v165_v60, %v171_v63 }
 0x107   :  { %v176_v5 = vmax.f32 %v167_v0, %v172_v2  ;;  %v177_v8 = vpack.c.bf16 %v175_v3, %v173_v6 }
 0x109   :  { %v178_v7 = vpack.c.bf16 %v176_v5, %v174_v4 }
 0x10b   :  { %415 = vmatprep.mubr.bf16.mxu1 %v178_v7 }
 0x10c   :  { %416 = vmatmul.mubr.bf16.vlgmr.msra.gmra.mxu1 %v177_v8 }
 0x1cc   :  { %v417_v20 = vpop.f32.mrf.mxu1 }
 0x1cd   :  { %v418_v23 = vadd.f32 %v417_v20, %v216_v19 }
 0x1ce   :  { %v419_v21 = vpop.f32.mrf.mxu1 }
 0x1cf   :  { %v420_v22 = vadd.f32 %v419_v21, %v220_v18  ;;  %v426_v30 = vmul.f32 0.2, %v418_v23 }
 0x1d0   :  { %v421_v24 = vpop.f32.mrf.mxu1 }
 0x1d1   :  { %v422_v25 = vadd.f32 %v421_v24, %v216_v19  ;;  %v427_v27 = vmul.f32 0.2, %v420_v22  ;;  %v430_v35 = vmax.f32 %v418_v23, %v426_v30 }
 0x1d2   :  { %v423_v26 = vpop.f32.mrf.mxu1 }
 0x1d3   :  { %v428_v28 = vmul.f32 0.2, %v422_v25  ;;  %v424_v29 = vadd.f32 %v423_v26, %v220_v18  ;;  %v431_v33 = vmax.f32 %v420_v22, %v427_v27 }
 0x1d5   :  { %v429_v31 = vmul.f32 0.2, %v424_v29  ;;  %v432_v32 = vmax.f32 %v422_v25, %v428_v28 }
 0x1d7   :  { %v433_v34 = vmax.f32 %v424_v29, %v429_v31  ;;  %v434_v37 = vpack.c.bf16 %v432_v32, %v430_v35 }
 0x1d9   :  { %v435_v36 = vpack.c.bf16 %v433_v34, %v431_v33 }
 0x1db   :  { %596 = vmatprep.mubr.bf16.mxu0 %v435_v36 }
 0x1dc   :  { %597 = vmatmul.mubr.bf16.vlgmr.msra.gmra.mxu0 %v434_v37 }
 0x29c   :  { %v725_v38 = vpop.f32.mrf.mxu0 }
 0x29e   :  { %v726_v39 = vpop.f32.mrf.mxu0 }
 0x29f   :  { %v727_v41 = vadd.f32 %v726_v39, %v725_v38 }
 0x2a0   :  { %v728_v42 = vpop.f32.mrf.mxu0 }
 0x2a1   :  { %v607_v43 = vadd.f32 %v727_v41, %v606_v40 }
 0x2a2   :  { %v729_v44 = vpop.f32.mrf.mxu0 }
 0x2a3   :  { %610 = vst.msk [vmem:[#allocation10] sm:$0xff] %vm609_vm1, %v607_v43 }
 0x2aa   :  { %v642_v45 = vld [vmem:[#allocation10] sm:$0xff] }
 0x2ab   :  { %643 = vst [vmem:[%s976_s7] sm:$0xff] %v642_v45 }
 0x2ac   :  { %649 = vsyncpa [#allocation4], 1 }
 0x2ad   :  { %650 = vsyncpa [#allocation6], 1 }
 0x2ae   :  { %651 = vsyncpa [#allocation9], 1 }

</bundles_post_ra>
